<compile_context>
chip_gen: v7x
topology: tpu7x:2x2x1
jax: 0.10.0
libtpu: 0.0.40
codegen_flags: <defaults>
</compile_context>

<pallas_src>
import jax
import jax.numpy as jnp
from jax import lax
from jax.experimental import pallas as pl
from jax.experimental.pallas import tpu as pltpu

_BRANCH_KEYS = ("out", "aero_diff_out", "ele_diff_out", "aero_src_out", "ele_src_out")
_BRANCH_WEIGHTS = (1.0, 0.2, 0.2, 0.2, 0.2)  # base, diff*0.2, diff*0.2, src*0.2, src*0.2

_LANES = 128
_MAX_TILE_ROWS = 4096     # 2 MiB / input / tile in f32
_CHUNK_ROWS = 256         # rows folded per inner step (32 f32 vregs / input)
_PAD_LOGIT = -200.0       # exp(-200) == 0 in f32  ->  BCE(pad_logit, 0) == 0 exactly
_PAD_LABEL = 0.0


def _round_up(x, m):
    return (x + m - 1) // m * m


def _multi_bce_kernel(x0_ref, x1_ref, x2_ref, x3_ref, x4_ref, y_ref, out_ref):
    """One row tile: weighted BCE over 5 logit branches, folded to (8, 128)."""
    tile_rows = y_ref.shape[0]
    chunk = min(_CHUNK_ROWS, tile_rows)
    n_full = tile_rows // chunk
    tail = tile_rows - n_full * chunk          # static, multiple of 8
    x_refs = (x0_ref, x1_ref, x2_ref, x3_ref, x4_ref)

    def fold(row0, nrows, acc):
        rows = pl.ds(row0, nrows)
        y = y_ref[rows, :].astype(jnp.float32)
        for x_ref, w in zip(x_refs, _BRANCH_WEIGHTS):
            x = x_ref[rows, :].astype(jnp.float32)
            # Numerically stable BCE-with-logits (matches PyTorch):
            #   loss = max(x, 0) - x*y + log(1 + exp(-|x|))
            l = jnp.maximum(x, 0.0) - x * y + jnp.log1p(jnp.exp(-jnp.abs(x)))
            # Sublane-group fold: (nrows, 128) -> (8, 128), pure vreg-wise adds
            # (no XLU tree reduce, no big live accumulator).
            acc = acc + w * jnp.sum(l.reshape(nrows // 8, 8, _LANES), axis=0)
        return acc

    acc = jnp.zeros((8, _LANES), jnp.float32)
    acc = lax.fori_loop(
        0, n_full,
        lambda c, a: fold(pl.multiple_of(c * chunk, chunk), chunk, a),
        acc,
        unroll=True,
    )
    if tail:                                   # static remainder chunk
        acc = fold(n_full * chunk, tail, acc)
    out_ref[...] = acc


def multi_diff_loss(outputs, labels):
    """Weighted sum of BCEWithLogits(mean) losses over the 5 output branches."""
    n = labels.size
    rows = pl.cdiv(n, _LANES)

    # Tile selection: cdiv-based, shape general.  Balanced tiles keep padding
    # under 8*num_tiles rows; split a single big tile in two so both v7x
    # TensorCores get work.
    num_tiles = pl.cdiv(rows, _MAX_TILE_ROWS)
    if num_tiles == 1 and rows >= 2048:
        num_tiles = 2
    tile_rows = _round_up(pl.cdiv(rows, num_tiles), 8)
    rows_padded = tile_rows * num_tiles
    n_padded = rows_padded * _LANES

    def prep(a, pad_value):
        flat = a.reshape(-1)
        if n_padded != n:
            # TODO(synk): a masked cdiv-grid last tile would avoid this extra
            # HBM pass for non-aligned shapes; padding keeps the kernel simple
            # and the pad values contribute exactly zero loss.
            flat = jnp.pad(flat, (0, n_padded - n), constant_values=pad_value)
        return flat.reshape(rows_padded, _LANES)

    xs = [prep(outputs[k], _PAD_LOGIT) for k in _BRANCH_KEYS]
    lab = prep(labels, _PAD_LABEL)
    out_rows = num_tiles * 8

    # VMEM budget: 6 inputs x 2 pipeline buffers x one tile, plus headroom for
    # outputs / Mosaic internals.  Capped for v7x's 64 MiB physical VMEM.
    tile_bytes = sum(2 * tile_rows * _LANES * a.dtype.itemsize for a in (*xs, lab))
    vmem_limit = int(min(tile_bytes + (8 << 20), 56 << 20))

    cost = pl.CostEstimate(
        flops=35 * n_padded,                       # ~7 VALU ops/branch/elem x 5
        transcendentals=10 * n_padded,             # exp + log1p per branch
        bytes_accessed=sum(a.size * a.dtype.itemsize for a in (*xs, lab))
        + out_rows * _LANES * 4,
    )

    in_spec = pl.BlockSpec((tile_rows, _LANES), lambda i: (i, 0))
    partials = pl.pallas_call(
        _multi_bce_kernel,
        out_shape=jax.ShapeDtypeStruct((out_rows, _LANES), jnp.float32),
        grid=(num_tiles,),
        in_specs=[in_spec] * 6,
        out_specs=pl.BlockSpec((8, _LANES), lambda i: (i, 0)),
        compiler_params=pltpu.CompilerParams(
            dimension_semantics=("parallel",),
            vmem_limit_bytes=vmem_limit,
        ),
        cost_estimate=cost,
    )(*xs, lab)

    # Tiny final reduction + mean normalization (divide by the TRUE count) in JAX.
    return jnp.sum(partials) / jnp.float32(n)


def _reference_loss(outputs, labels):
    labels = labels.astype(jnp.float32)

    def bce_mean(x):
        x = x.astype(jnp.float32)
        return jnp.mean(
            jnp.maximum(x, 0.0) - x * labels + jnp.log1p(jnp.exp(-jnp.abs(x)))
        )

    total = 0.0
    for k, w in zip(_BRANCH_KEYS, _BRANCH_WEIGHTS):
        total += w * bce_mean(outputs[k])
    return total


if __name__ == "__main__":
    key = jax.random.PRNGKey(0)
    B, C, H, W = 2, 4, 16, 16  # 2048 elems -> (16, 128) slab, single row tile

    keys = jax.random.split(key, len(_BRANCH_KEYS) + 1)
    outputs = {
        k: jax.random.normal(keys[i], (B, C, H, W), dtype=jnp.float32)
        for i, k in enumerate(_BRANCH_KEYS)
    }
    labels = (jax.random.uniform(keys[-1], (B, C, H, W)) > 0.5).astype(jnp.float32)

    loss = multi_diff_loss(outputs, labels)
    jax.block_until_ready(loss)

    ref = _reference_loss(outputs, labels)
    assert jnp.allclose(loss, ref, rtol=1e-5, atol=1e-5), (loss, ref)

    print("KERNEL_OK")
</pallas_src>

<mosaic_0001>
module attributes {stable_mosaic.version = 11 : i64} {
  func.func @_multi_bce_kernel(%arg0: i32, %arg1: memref<16x128xf32, #tpu.memory_space<vmem>>, %arg2: memref<16x128xf32, #tpu.memory_space<vmem>>, %arg3: memref<16x128xf32, #tpu.memory_space<vmem>>, %arg4: memref<16x128xf32, #tpu.memory_space<vmem>>, %arg5: memref<16x128xf32, #tpu.memory_space<vmem>>, %arg6: memref<16x128xf32, #tpu.memory_space<vmem>>, %arg7: memref<8x128xf32, #tpu.memory_space<vmem>>) attributes {dimension_semantics = [#tpu.dimension_semantics<parallel>], iteration_bounds = array<i64: 1>, scalar_prefetch = 0 : i64, scratch_operands = 0 : i64, tpu.core_type = #tpu.core_type<tc>, window_params = [{transform_indices = @transform_0, window_bounds = array<i64: 16, 128>}, {transform_indices = @transform_1, window_bounds = array<i64: 16, 128>}, {transform_indices = @transform_2, window_bounds = array<i64: 16, 128>}, {transform_indices = @transform_3, window_bounds = array<i64: 16, 128>}, {transform_indices = @transform_4, window_bounds = array<i64: 16, 128>}, {transform_indices = @transform_5, window_bounds = array<i64: 16, 128>}, {transform_indices = @transform_6, window_bounds = array<i64: 8, 128>}]} {
    %cst = arith.constant 0.000000e+00 : f32
    %0 = vector.broadcast %cst : f32 to vector<8x128xf32>
    %c0_i32 = arith.constant 0 : i32
    %c16_i32 = arith.constant 16 : i32
    %1 = arith.muli %c0_i32, %c16_i32 : i32
    %2 = tpu.assume_multiple %1, 16 : i32
    %3 = arith.index_cast %2 : i32 to index
    %c0 = arith.constant 0 : index
    %4 = vector.load %arg6[%3, %c0] : memref<16x128xf32, #tpu.memory_space<vmem>>, vector<16x128xf32>
    %5 = arith.index_cast %2 : i32 to index
    %c0_0 = arith.constant 0 : index
    %6 = vector.load %arg1[%5, %c0_0] : memref<16x128xf32, #tpu.memory_space<vmem>>, vector<16x128xf32>
    %cst_1 = arith.constant 0.000000e+00 : f32
    %7 = vector.broadcast %cst_1 : f32 to vector<16x128xf32>
    %8 = arith.maximumf %6, %7 : vector<16x128xf32>
    %9 = arith.mulf %6, %4 : vector<16x128xf32>
    %10 = arith.subf %8, %9 : vector<16x128xf32>
    %11 = math.absf %6 : vector<16x128xf32>
    %cst_2 = arith.constant 0.000000e+00 : f32
    %12 = vector.broadcast %cst_2 : f32 to vector<16x128xf32>
    %13 = arith.subf %12, %11 : vector<16x128xf32>
    %14 = math.exp %13 : vector<16x128xf32>
    %15 = math.log1p %14 : vector<16x128xf32>
    %16 = arith.addf %10, %15 : vector<16x128xf32>
    %17 = vector.shape_cast %16 : vector<16x128xf32> to vector<2x8x128xf32>
    %cst_3 = arith.constant dense<0.000000e+00> : vector<8x128xf32>
    %18 = vector.multi_reduction <add>, %17, %cst_3 [0] : vector<2x8x128xf32> to vector<8x128xf32>
    %cst_4 = arith.constant 1.000000e+00 : f32
    %19 = vector.broadcast %cst_4 : f32 to vector<8x128xf32>
    %20 = arith.mulf %19, %18 : vector<8x128xf32>
    %21 = arith.addf %0, %20 : vector<8x128xf32>
    %22 = arith.index_cast %2 : i32 to index
    %c0_5 = arith.constant 0 : index
    %23 = vector.load %arg2[%22, %c0_5] : memref<16x128xf32, #tpu.memory_space<vmem>>, vector<16x128xf32>
    %cst_6 = arith.constant 0.000000e+00 : f32
    %24 = vector.broadcast %cst_6 : f32 to vector<16x128xf32>
    %25 = arith.maximumf %23, %24 : vector<16x128xf32>
    %26 = arith.mulf %23, %4 : vector<16x128xf32>
    %27 = arith.subf %25, %26 : vector<16x128xf32>
    %28 = math.absf %23 : vector<16x128xf32>
    %cst_7 = arith.constant 0.000000e+00 : f32
    %29 = vector.broadcast %cst_7 : f32 to vector<16x128xf32>
    %30 = arith.subf %29, %28 : vector<16x128xf32>
    %31 = math.exp %30 : vector<16x128xf32>
    %32 = math.log1p %31 : vector<16x128xf32>
    %33 = arith.addf %27, %32 : vector<16x128xf32>
    %34 = vector.shape_cast %33 : vector<16x128xf32> to vector<2x8x128xf32>
    %cst_8 = arith.constant dense<0.000000e+00> : vector<8x128xf32>
    %35 = vector.multi_reduction <add>, %34, %cst_8 [0] : vector<2x8x128xf32> to vector<8x128xf32>
    %cst_9 = arith.constant 2.000000e-01 : f32
    %36 = vector.broadcast %cst_9 : f32 to vector<8x128xf32>
    %37 = arith.mulf %36, %35 : vector<8x128xf32>
    %38 = arith.addf %21, %37 : vector<8x128xf32>
    %39 = arith.index_cast %2 : i32 to index
    %c0_10 = arith.constant 0 : index
    %40 = vector.load %arg3[%39, %c0_10] : memref<16x128xf32, #tpu.memory_space<vmem>>, vector<16x128xf32>
    %cst_11 = arith.constant 0.000000e+00 : f32
    %41 = vector.broadcast %cst_11 : f32 to vector<16x128xf32>
    %42 = arith.maximumf %40, %41 : vector<16x128xf32>
    %43 = arith.mulf %40, %4 : vector<16x128xf32>
    %44 = arith.subf %42, %43 : vector<16x128xf32>
    %45 = math.absf %40 : vector<16x128xf32>
    %cst_12 = arith.constant 0.000000e+00 : f32
    %46 = vector.broadcast %cst_12 : f32 to vector<16x128xf32>
    %47 = arith.subf %46, %45 : vector<16x128xf32>
    %48 = math.exp %47 : vector<16x128xf32>
    %49 = math.log1p %48 : vector<16x128xf32>
    %50 = arith.addf %44, %49 : vector<16x128xf32>
    %51 = vector.shape_cast %50 : vector<16x128xf32> to vector<2x8x128xf32>
    %cst_13 = arith.constant dense<0.000000e+00> : vector<8x128xf32>
    %52 = vector.multi_reduction <add>, %51, %cst_13 [0] : vector<2x8x128xf32> to vector<8x128xf32>
    %cst_14 = arith.constant 2.000000e-01 : f32
    %53 = vector.broadcast %cst_14 : f32 to vector<8x128xf32>
    %54 = arith.mulf %53, %52 : vector<8x128xf32>
    %55 = arith.addf %38, %54 : vector<8x128xf32>
    %56 = arith.index_cast %2 : i32 to index
    %c0_15 = arith.constant 0 : index
    %57 = vector.load %arg4[%56, %c0_15] : memref<16x128xf32, #tpu.memory_space<vmem>>, vector<16x128xf32>
    %cst_16 = arith.constant 0.000000e+00 : f32
    %58 = vector.broadcast %cst_16 : f32 to vector<16x128xf32>
    %59 = arith.maximumf %57, %58 : vector<16x128xf32>
    %60 = arith.mulf %57, %4 : vector<16x128xf32>
    %61 = arith.subf %59, %60 : vector<16x128xf32>
    %62 = math.absf %57 : vector<16x128xf32>
    %cst_17 = arith.constant 0.000000e+00 : f32
    %63 = vector.broadcast %cst_17 : f32 to vector<16x128xf32>
    %64 = arith.subf %63, %62 : vector<16x128xf32>
    %65 = math.exp %64 : vector<16x128xf32>
    %66 = math.log1p %65 : vector<16x128xf32>
    %67 = arith.addf %61, %66 : vector<16x128xf32>
    %68 = vector.shape_cast %67 : vector<16x128xf32> to vector<2x8x128xf32>
    %cst_18 = arith.constant dense<0.000000e+00> : vector<8x128xf32>
    %69 = vector.multi_reduction <add>, %68, %cst_18 [0] : vector<2x8x128xf32> to vector<8x128xf32>
    %cst_19 = arith.constant 2.000000e-01 : f32
    %70 = vector.broadcast %cst_19 : f32 to vector<8x128xf32>
    %71 = arith.mulf %70, %69 : vector<8x128xf32>
    %72 = arith.addf %55, %71 : vector<8x128xf32>
    %73 = arith.index_cast %2 : i32 to index
    %c0_20 = arith.constant 0 : index
    %74 = vector.load %arg5[%73, %c0_20] : memref<16x128xf32, #tpu.memory_space<vmem>>, vector<16x128xf32>
    %cst_21 = arith.constant 0.000000e+00 : f32
    %75 = vector.broadcast %cst_21 : f32 to vector<16x128xf32>
    %76 = arith.maximumf %74, %75 : vector<16x128xf32>
    %77 = arith.mulf %74, %4 : vector<16x128xf32>
    %78 = arith.subf %76, %77 : vector<16x128xf32>
    %79 = math.absf %74 : vector<16x128xf32>
    %cst_22 = arith.constant 0.000000e+00 : f32
    %80 = vector.broadcast %cst_22 : f32 to vector<16x128xf32>
    %81 = arith.subf %80, %79 : vector<16x128xf32>
    %82 = math.exp %81 : vector<16x128xf32>
    %83 = math.log1p %82 : vector<16x128xf32>
    %84 = arith.addf %78, %83 : vector<16x128xf32>
    %85 = vector.shape_cast %84 : vector<16x128xf32> to vector<2x8x128xf32>
    %cst_23 = arith.constant dense<0.000000e+00> : vector<8x128xf32>
    %86 = vector.multi_reduction <add>, %85, %cst_23 [0] : vector<2x8x128xf32> to vector<8x128xf32>
    %cst_24 = arith.constant 2.000000e-01 : f32
    %87 = vector.broadcast %cst_24 : f32 to vector<8x128xf32>
    %88 = arith.mulf %87, %86 : vector<8x128xf32>
    %89 = arith.addf %72, %88 : vector<8x128xf32>
    %c1_i32 = arith.constant 1 : i32
    %c0_25 = arith.constant 0 : index
    %c0_26 = arith.constant 0 : index
    %90 = vector.load %arg7[%c0_25, %c0_26] : memref<8x128xf32, #tpu.memory_space<vmem>>, vector<8x128xf32>
    tpu.vector_store %arg7[%c0_25, %c0_26], %89 {strides = array<i32>} : memref<8x128xf32, #tpu.memory_space<vmem>>, vector<8x128xf32>,
    return
  }
  func.func @transform_0(%arg0: i32) -> (i32, i32) {
    %c0_i32 = arith.constant 0 : i32
    %c0_i32_0 = arith.constant 0 : i32
    return %arg0, %c0_i32 : i32, i32
  }
  func.func @transform_1(%arg0: i32) -> (i32, i32) {
    %c0_i32 = arith.constant 0 : i32
    %c0_i32_0 = arith.constant 0 : i32
    return %arg0, %c0_i32 : i32, i32
  }
  func.func @transform_2(%arg0: i32) -> (i32, i32) {
    %c0_i32 = arith.constant 0 : i32
    %c0_i32_0 = arith.constant 0 : i32
    return %arg0, %c0_i32 : i32, i32
  }
  func.func @transform_3(%arg0: i32) -> (i32, i32) {
    %c0_i32 = arith.constant 0 : i32
    %c0_i32_0 = arith.constant 0 : i32
    return %arg0, %c0_i32 : i32, i32
  }
  func.func @transform_4(%arg0: i32) -> (i32, i32) {
    %c0_i32 = arith.constant 0 : i32
    %c0_i32_0 = arith.constant 0 : i32
    return %arg0, %c0_i32 : i32, i32
  }
  func.func @transform_5(%arg0: i32) -> (i32, i32) {
    %c0_i32 = arith.constant 0 : i32
    %c0_i32_0 = arith.constant 0 : i32
    return %arg0, %c0_i32 : i32, i32
  }
  func.func @transform_6(%arg0: i32) -> (i32, i32) {
    %c0_i32 = arith.constant 0 : i32
    %c0_i32_0 = arith.constant 0 : i32
    return %arg0, %c0_i32 : i32, i32
  }
}

</mosaic_0001>

<bundles_post_ra>
// kernel: tpu_custom_call.1
= control target key start
LH: loop header
LB: loop body
LE: loop exit
PB: predicated region body
PF: predicated region fallthrough
CT: control target
= control target key end

     0   :  { %11 = vsyncpa [#allocation3], 0  ;;  %s829_s0 = inlined_call_operand.hbm [shape: f32[16,128], index: 0, kind: input, shape index: {}]   ;;  %s830_s1 = inlined_call_operand.hbm [shape: f32[16,128], index: 1, kind: input, shape index: {}]   ;;  %s831_s2 = inlined_call_operand.hbm [shape: f32[16,128], index: 2, kind: input, shape index: {}]   ;;  %s832_s3 = inlined_call_operand.hbm [shape: f32[16,128], index: 3, kind: input, shape index: {}]   ;;  %s833_s4 = inlined_call_operand.hbm [shape: f32[16,128], index: 4, kind: input, shape index: {}]   ;;  %s834_s5 = inlined_call_operand.vmem [shape: f32[16,128], index: 5, kind: input, shape index: {}]   ;;  %s835_s6 = inlined_call_operand.hbm [shape: f32[8,128], index: 6, kind: output, shape index: {}]  }
   0x1   :  { %12 = vsyncpa [#allocation6], 0 }
   0x2   :  { %13 = vsyncpa [#allocation9], 0 }
   0x3   :  { %14 = vsyncpa [#allocation4], 0  ;;  %s494_s21 = smov [#allocation5]   ;;  %s495_s23 = smov [#allocation8]  }
   0x4   :  { %s32_s22 = sshll.u32 %s494_s21, 4  ;;  %s56_s24 = sshll.u32 %s495_s23, 4  ;;  %s33_s22 = int_to_ptr.vmem [resolvable:$true] %s32_s22  ;;  %s537_s24 = int_to_ptr.vmem [resolvable:$true] %s56_s24 }
   0x5   :  { %s354_s27 = scalar_lea.hbm %s830_s1, 256 }
   0x6   :  { %p355_p0 = scmp.ne.s32.totalorder %s830_s1, %s354_s27  ;;  %p358_p1 = scmp.lt.u32.totalorder %s354_s27, %s830_s1 }
   0x8   :  { %p360_p2 = pnand %p358_p1, %p355_p0 }
   0xa   :  { %363 = shalt.err (!%p360_p2)
}
   0xb   :  { %s364_s8 = scalar_lea.vmem %s33_s22, 256  ;;  %p369_p4 = scmp.lt.s32.totalorder %s33_s22, %s33_s22 }
   0xc   :  { %p365_p3 = scmp.ne.s32.totalorder %s33_s22, %s364_s8  ;;  %p370_p5 = scmp.lt.s32.totalorder %s364_s8, %s364_s8 }
   0xe   :  { %p371_p6 = por %p370_p5, %p369_p4 }
  0x10   :  { %p372_p7 = pnand %p371_p6, %p365_p3 }
  0x12   :  { %375 = shalt.err (!%p372_p7)
}
  0x13   :  { %s496_s9 = smov 128   ;;  %s497_s10 = smov 8  }
  0x14   :  { %38 = dma.hbm_to_vmem [thread:$0]  %s830_s1, 256, %s33_s22, [#allocation6], %s496_s9, %s496_s9, %s497_s10  }
  0x15   :  { %s376_s15 = scalar_lea.hbm %s832_s3, 256 }
  0x16   :  { %p377_p8 = scmp.ne.s32.totalorder %s832_s3, %s376_s15  ;;  %p380_p9 = scmp.lt.u32.totalorder %s376_s15, %s832_s3 }
  0x18   :  { %p382_p10 = pnand %p380_p9, %p377_p8 }
  0x1a   :  { %385 = shalt.err (!%p382_p10)
}
  0x1b   :  { %s386_s20 = scalar_lea.vmem %s537_s24, 256  ;;  %p391_p12 = scmp.lt.s32.totalorder %s537_s24, %s537_s24 }
  0x1c   :  { %p387_p11 = scmp.ne.s32.totalorder %s537_s24, %s386_s20  ;;  %p392_p13 = scmp.lt.s32.totalorder %s386_s20, %s386_s20 }
  0x1e   :  { %p393_p0 = por %p392_p13, %p391_p12 }
  0x20   :  { %p394_p1 = pnand %p393_p0, %p387_p11 }
  0x22   :  { %397 = shalt.err (!%p394_p1)
}
  0x23   :  { %62 = dma.hbm_to_vmem [thread:$0]  %s832_s3, 256, %s537_s24, [#allocation9], %s496_s9, %s496_s9, %s497_s10  }
  0x24   :  { %s498_s22 = smov [#allocation2]   ;;  %s499_s25 = smov [#allocation7]  }
  0x25   :  { %s20_s23 = sshll.u32 %s498_s22, 4  ;;  %s44_s26 = sshll.u32 %s499_s25, 4  ;;  %s21_s23 = int_to_ptr.vmem [resolvable:$true] %s20_s23  ;;  %s574_s26 = int_to_ptr.vmem [resolvable:$true] %s44_s26 }
  0x26   :  { %s398_s29 = scalar_lea.hbm %s829_s0, 256 }
  0x27   :  { %p399_p2 = scmp.ne.s32.totalorder %s829_s0, %s398_s29  ;;  %p402_p3 = scmp.lt.u32.totalorder %s398_s29, %s829_s0 }
  0x29   :  { %p404_p4 = pnand %p402_p3, %p399_p2 }
  0x2b   :  { %407 = shalt.err (!%p404_p4)
}
  0x2c   :  { %s408_s3 = scalar_lea.vmem %s21_s23, 256  ;;  %p413_p6 = scmp.lt.s32.totalorder %s21_s23, %s21_s23 }
  0x2d   :  { %p409_p5 = scmp.ne.s32.totalorder %s21_s23, %s408_s3  ;;  %p414_p7 = scmp.lt.s32.totalorder %s408_s3, %s408_s3 }
  0x2f   :  { %p415_p8 = por %p414_p7, %p413_p6 }
  0x31   :  { %p416_p9 = pnand %p415_p8, %p409_p5 }
  0x33   :  { %419 = shalt.err (!%p416_p9)
}
  0x34   :  { %26 = dma.hbm_to_vmem [thread:$0]  %s829_s0, 256, %s21_s23, [#allocation3], %s496_s9, %s496_s9, %s497_s10  }
  0x35   :  { %s420_s15 = scalar_lea.hbm %s831_s2, 256 }
  0x36   :  { %p421_p10 = scmp.ne.s32.totalorder %s831_s2, %s420_s15  ;;  %p424_p11 = scmp.lt.u32.totalorder %s420_s15, %s831_s2 }
  0x38   :  { %p426_p12 = pnand %p424_p11, %p421_p10 }
  0x3a   :  { %429 = shalt.err (!%p426_p12)
}
  0x3b   :  { %s430_s20 = scalar_lea.vmem %s574_s26, 256  ;;  %p435_p0 = scmp.lt.s32.totalorder %s574_s26, %s574_s26 }
  0x3c   :  { %p431_p13 = scmp.ne.s32.totalorder %s574_s26, %s430_s20  ;;  %p436_p1 = scmp.lt.s32.totalorder %s430_s20, %s430_s20 }
  0x3e   :  { %p437_p2 = por %p436_p1, %p435_p0 }
  0x40   :  { %p438_p3 = pnand %p437_p2, %p431_p13 }
  0x42   :  { %441 = shalt.err (!%p438_p3)
}
  0x43   :  { %50 = dma.hbm_to_vmem [thread:$0]  %s831_s2, 256, %s574_s26, [#allocation6], %s496_s9, %s496_s9, %s497_s10  }
  0x44   :  { %s500_s21 = smov [#allocation10]   ;;  %s442_s27 = scalar_lea.hbm %s833_s4, 256 }
  0x45   :  { %s68_s22 = sshll.u32 %s500_s21, 4  ;;  %p443_p4 = scmp.ne.s32.totalorder %s833_s4, %s442_s27  ;;  %s69_s22 = int_to_ptr.vmem [resolvable:$true] %s68_s22 }
  0x46   :  { %p446_p5 = scmp.lt.u32.totalorder %s442_s27, %s833_s4 }
  0x48   :  { %p448_p6 = pnand %p446_p5, %p443_p4 }
  0x4a   :  { %451 = shalt.err (!%p448_p6)
}
  0x4b   :  { %s452_s8 = scalar_lea.vmem %s69_s22, 256  ;;  %p457_p8 = scmp.lt.s32.totalorder %s69_s22, %s69_s22 }
  0x4c   :  { %p453_p7 = scmp.ne.s32.totalorder %s69_s22, %s452_s8  ;;  %p458_p9 = scmp.lt.s32.totalorder %s452_s8, %s452_s8 }
  0x4e   :  { %p459_p10 = por %p458_p9, %p457_p8 }
  0x50   :  { %p460_p11 = pnand %p459_p10, %p453_p7 }
  0x52   :  { %463 = shalt.err (!%p460_p11)
}
  0x53   :  { %74 = dma.hbm_to_vmem [thread:$0]  %s833_s4, 256, %s69_s22, [#allocation9], %s496_s9, %s496_s9, %s497_s10  }
  0x54   :  { %486 = dma.done.wait [#allocation3], 256  }
  0x55   :  { %487 = vsyncadd [#allocation3], 4294967040 }
  0x56   :  { %488 = dma.done.wait [#allocation6], 512  }
  0x57   :  { %489 = vsyncadd [#allocation6], 4294966784 }
  0x58   :  { %490 = dma.done.wait [#allocation9], 512  }
  0x59   :  { %491 = vsyncadd [#allocation9], 4294966784  ;;  %v626_v0 = vld [vmem:[#allocation2] sm:$0xff]  ;;  %v628_v1 = vld [vmem:[#allocation2 + $0x8] sm:$0xff] }
  0x5a   :  { %v102_v2 = vand.u32 2147483647, %v626_v0  ;;  %v631_v3 = vld [vmem:[#allocation5] sm:$0xff]  ;;  %v103_v4 = vand.u32 2147483647, %v628_v1  ;;  %v634_v5 = vld [vmem:[#allocation5 + $0x8] sm:$0xff] }
  0x5b   :  { %v140_v8 = vand.u32 2147483647, %v631_v3  ;;  %v141_v10 = vand.u32 2147483647, %v634_v5  ;;  %v638_v11 = vld [vmem:[#allocation7] sm:$0xff]  ;;  %v640_v12 = vld [vmem:[#allocation7 + $0x8] sm:$0xff] }
  0x5c   :  { %v104_v6 = vsub.f32 0.0, %v102_v2  ;;  %v105_v7 = vsub.f32 0.0, %v103_v4  ;;  %v642_v16 = vld [vmem:[#allocation8] sm:$0xff]  ;;  %v179_v18 = vand.u32 2147483647, %v638_v11  ;;  %v646_v21 = vld [vmem:[#allocation8 + $0x8] sm:$0xff] }
  0x5d   :  { %v142_v14 = vsub.f32 0.0, %v140_v8  ;;  %v143_v15 = vsub.f32 0.0, %v141_v10  ;;  %v180_v19 = vand.u32 2147483647, %v640_v12  ;;  %v218_v24 = vand.u32 2147483647, %v642_v16 }
  0x5e   :  { %v106_v9 = vmul.f32 1.442695, %v104_v6  ;;  %v108_v13 = vmul.f32 1.442695, %v105_v7  ;;  %v181_v22 = vsub.f32 0.0, %v179_v18  ;;  %v650_v32 = vld [vmem:[#allocation10] sm:$0xff] }
  0x5f   :  { %v144_v17 = vmul.f32 1.442695, %v142_v14  ;;  %v146_v20 = vmul.f32 1.442695, %v143_v15  ;;  %v182_v23 = vsub.f32 0.0, %v180_v19  ;;  %v220_v28 = vsub.f32 0.0, %v218_v24 }
  0x60   :  { %314 = vpow2.f32 %v106_v9  ;;  %v183_v25 = vmul.f32 1.442695, %v181_v22  ;;  %v219_v27 = vand.u32 2147483647, %v646_v21  ;;  %v657_v36 = vld [vmem:[#allocation10 + $0x8] sm:$0xff]  ;;  %v662_v37 = vld [vmem:[%s834_s5] sm:$0xff] }
  0x61   :  { %316 = vpow2.f32 %v108_v13  ;;  %v185_v26 = vmul.f32 1.442695, %v182_v23  ;;  %v222_v30 = vmul.f32 1.442695, %v220_v28  ;;  %v667_v38 = vld [vmem:[%s834_s5 + $0x8] sm:$0xff]  ;;  %v96_v39 = vmax.f32 %v626_v0, 0.0 }
  0x62   :  { %318 = vpow2.f32 %v144_v17  ;;  %v221_v29 = vsub.f32 0.0, %v219_v27  ;;  %v257_v40 = vand.u32 2147483647, %v650_v32  ;;  %v97_v42 = vmax.f32 %v628_v1, 0.0  ;;  %s501_s5 = smov [#allocation11]  }
  0x63   :  { %320 = vpow2.f32 %v146_v20  ;;  %v98_v43 = vmul.f32 %v626_v0, %v662_v37  ;;  %v99_v44 = vmul.f32 %v628_v1, %v667_v38  ;;  %v134_v45 = vmax.f32 %v631_v3, 0.0  ;;  %s295_s3 = sshll.u32 %s501_s5, 4  ;;  %s296_s3 = int_to_ptr.vmem [resolvable:$true] %s295_s3 }
  0x64   :  { %322 = vpow2.f32 %v183_v25  ;;  %v224_v31 = vmul.f32 1.442695, %v221_v29  ;;  %v135_v48 = vmax.f32 %v634_v5, 0.0  ;;  %v258_v50 = vand.u32 2147483647, %v657_v36  ;;  %s464_s24 = scalar_lea.vmem %s296_s3, 128  ;;  %p469_p13 = scmp.lt.s32.totalorder %s296_s3, %s296_s3 }
  0x65   :  { %324 = vpow2.f32 %v185_v26  ;;  %v136_v51 = vmul.f32 %v631_v3, %v662_v37  ;;  %v137_v52 = vmul.f32 %v634_v5, %v667_v38  ;;  %v173_v54 = vmax.f32 %v638_v11, 0.0  ;;  %p465_p12 = scmp.ne.s32.totalorder %s296_s3, %s464_s24  ;;  %p470_p0 = scmp.lt.s32.totalorder %s464_s24, %s464_s24 }
  0x66   :  { %326 = vpow2.f32 %v222_v30  ;;  %v175_v55 = vmul.f32 %v638_v11, %v662_v37  ;;  %v259_v56 = vsub.f32 0.0, %v257_v40  ;;  %v174_v58 = vmax.f32 %v640_v12, 0.0 }
  0x67   :  { %328 = vpow2.f32 %v224_v31  ;;  %v176_v59 = vmul.f32 %v640_v12, %v667_v38  ;;  %v700_v61 = vsub.f32 %v96_v39, %v98_v43  ;;  %v260_v63 = vsub.f32 0.0, %v258_v50  ;;  %p471_p1 = por %p470_p0, %p469_p13 }
  0x68   :  { %v703_v0 = vsub.f32 %v97_v42, %v99_v44  ;;  %v705_v1 = vsub.f32 %v134_v45, %v136_v51  ;;  %v707_v2 = vsub.f32 %v135_v48, %v137_v52  ;;  %v713_v6 = vsub.f32 %v173_v54, %v175_v55 }
  0x69   :  { %v261_v7 = vmul.f32 1.442695, %v259_v56  ;;  %v718_v10 = vsub.f32 %v174_v58, %v176_v59  ;;  %v212_v14 = vmax.f32 %v642_v16, 0.0  ;;  %v263_v15 = vmul.f32 1.442695, %v260_v63  ;;  %p472_p2 = pnand %p471_p1, %p465_p12 }
  0x6a   :  { %v652_v33 = vpop.eup %314  ;;  %v213_v23 = vmax.f32 %v646_v21, 0.0  ;;  %v732_v27 = vmul.f32 %v642_v16, %v662_v37  ;;  %v251_v16 = vmax.f32 %v650_v32, 0.0  ;;  %v254_v56 = vmul.f32 %v657_v36, %v667_v38 }
  0x6b   :  { %v654_v34 = vpop.eup %316  ;;  %v110_v35 = vadd.f32 1.0, %v652_v33  ;;  %v113_v12 = vmul.f32 -0.5, %v652_v33  ;;  %v116_v13 = vand.u32 2147483647, %v652_v33 }
  0x6c   :  { %v671_v41 = vpop.eup %318  ;;  %v119_v47 = vadd.f32 1.0, %v654_v34  ;;  %v122_v17 = vmul.f32 -0.5, %v654_v34  ;;  %v125_v18 = vand.u32 2147483647, %v654_v34 }
  0x6d   :  { %v679_v46 = vpop.eup %320  ;;  %v148_v49 = vadd.f32 1.0, %v671_v41  ;;  %330 = vlog2.f32 %v110_v35  ;;  %v151_v5 = vmul.f32 -0.5, %v671_v41  ;;  %v114_v29 = vadd.f32 1.0, %v113_v12 }
  0x6e   :  { %v157_v53 = vadd.f32 1.0, %v679_v46  ;;  %v693_v57 = vpop.eup %322  ;;  %v160_v9 = vmul.f32 -0.5, %v679_v46  ;;  %v154_v30 = vand.u32 2147483647, %v671_v41  ;;  %v163_v31 = vand.u32 2147483647, %v679_v46 }
  0x6f   :  { %332 = vlog2.f32 %v148_v49  ;;  %v698_v60 = vpop.eup %324  ;;  %v187_v62 = vadd.f32 1.0, %v693_v57  ;;  %v152_v20 = vadd.f32 1.0, %v151_v5  ;;  %v190_v22 = vmul.f32 -0.5, %v693_v57 }
  0x70   :  { %334 = vlog2.f32 %v157_v53  ;;  %v196_v3 = vadd.f32 1.0, %v698_v60  ;;  %v710_v4 = vpop.eup %326  ;;  %v161_v25 = vadd.f32 1.0, %v160_v9  ;;  %v199_v26 = vmul.f32 -0.5, %v698_v60 }
  0x71   :  { %336 = vlog2.f32 %v119_v47  ;;  %v715_v8 = vpop.eup %328  ;;  %v226_v11 = vadd.f32 1.0, %v710_v4  ;;  %vm736_vm0 = vcmp.lt.f32.partialorder %v116_v13, 0.0004427343  ;;  %v123_v40 = vadd.f32 1.0, %v122_v17 }
  0x72   :  { %338 = vlog2.f32 %v187_v62  ;;  %v235_v19 = vadd.f32 1.0, %v715_v8  ;;  %vm740_vm1 = vcmp.lt.f32.partialorder %v125_v18, 0.0004427343  ;;  %v229_v43 = vmul.f32 -0.5, %v710_v4 }
  0x73   :  { %340 = vlog2.f32 %v196_v3  ;;  %v153_v45 = vmul.f32 %v671_v41, %v152_v20  ;;  %v191_v47 = vadd.f32 1.0, %v190_v22  ;;  %v193_v48 = vand.u32 2147483647, %v693_v57 }
  0x74   :  { %342 = vlog2.f32 %v226_v11  ;;  %v238_v49 = vmul.f32 -0.5, %v715_v8  ;;  %v162_v52 = vmul.f32 %v679_v46, %v161_v25  ;;  %v200_v53 = vadd.f32 1.0, %v199_v26 }
  0x75   :  { %344 = vpow2.f32 %v261_v7  ;;  %v115_v55 = vmul.f32 %v652_v33, %v114_v29  ;;  %vm750_vm2 = vcmp.lt.f32.partialorder %v154_v30, 0.0004427343  ;;  %vm754_vm3 = vcmp.lt.f32.partialorder %v163_v31, 0.0004427343 }
  0x76   :  { %346 = vlog2.f32 %v235_v19  ;;  %v202_v41 = vand.u32 2147483647, %v698_v60  ;;  %v124_v3 = vmul.f32 %v654_v34, %v123_v40  ;;  %v230_v46 = vadd.f32 1.0, %v229_v43 }
  0x77   :  { %v331_v24 = vpop.eup %330  ;;  %348 = vpow2.f32 %v263_v15  ;;  %v192_v7 = vmul.f32 %v693_v57, %v191_v47  ;;  %vm761_vm4 = vcmp.lt.f32.partialorder %v193_v48, 0.0004427343  ;;  %v239_v9 = vadd.f32 1.0, %v238_v49 }
  0x78   :  { %v112_v62 = vmul.f32 0.6931472, %v331_v24  ;;  %v201_v17 = vmul.f32 %v698_v60, %v200_v53  ;;  %vm770_vm5 = vcmp.lt.f32.partialorder %v202_v41, 0.0004427343  ;;  %v215_v57 = vmul.f32 %v646_v21, %v667_v38 }
  0x79   :  { %v333_v28 = vpop.eup %332  ;;  %v232_v19 = vand.u32 2147483647, %v710_v4  ;;  %v241_v20 = vand.u32 2147483647, %v715_v8  ;;  %v231_v60 = vmul.f32 %v710_v4, %v230_v46  ;;  %v253_v21 = vmul.f32 %v650_v32, %v662_v37 }
  0x7a   :  { %v335_v35 = vpop.eup %334  ;;  %v150_v50 = vmul.f32 0.6931472, %v333_v28  ;;  %v118_v24 = vsel %vm736_vm0, %v115_v55, %v112_v62  ;;  %v217_v47 = vsub.f32 %v213_v23, %v215_v57  ;;  %v252_v55 = vmax.f32 %v657_v36, 0.0 }
  0x7b   :  { %v337_v44 = vpop.eup %336  ;;  %v159_v51 = vmul.f32 0.6931472, %v335_v35  ;;  %v240_v35 = vmul.f32 %v715_v8, %v239_v9  ;;  %vm790_vm6 = vcmp.lt.f32.partialorder %v232_v19, 0.0004427343  ;;  %vm794_vm7 = vcmp.lt.f32.partialorder %v241_v20, 0.0004427343 }
  0x7c   :  { %v339_v54 = vpop.eup %338  ;;  %v121_v63 = vmul.f32 0.6931472, %v337_v44  ;;  %v156_v12 = vsel %vm750_vm2, %v153_v45, %v150_v50  ;;  %v128_v44 = vadd.f32 %v118_v24, %v700_v61  ;;  %v216_v45 = vsub.f32 %v212_v14, %v732_v27 }
  0x7d   :  { %v341_v59 = vpop.eup %340  ;;  %v189_v5 = vmul.f32 0.6931472, %v339_v54  ;;  %v165_v13 = vsel %vm754_vm3, %v162_v52, %v159_v51  ;;  %v166_v29 = vadd.f32 %v156_v12, %v705_v1  ;;  %v255_v62 = vsub.f32 %v251_v16, %v253_v21 }
  0x7e   :  { %v343_v11 = vpop.eup %342  ;;  %v198_v15 = vmul.f32 0.6931472, %v341_v59  ;;  %v127_v25 = vsel %vm740_vm1, %v124_v3, %v121_v63  ;;  %v167_v30 = vadd.f32 %v165_v13, %v707_v2 }
  0x7f   :  { %v345_v34 = vpop.eup %344  ;;  %v195_v31 = vsel %vm761_vm4, %v192_v7, %v189_v5  ;;  %v228_v40 = vmul.f32 0.6931472, %v343_v11  ;;  %v129_v8 = vadd.f32 %v127_v25, %v703_v0  ;;  %v256_v7 = vsub.f32 %v252_v55, %v254_v56 }
  0x80   :  { %v347_v22 = vpop.eup %346  ;;  %v265_v26 = vadd.f32 1.0, %v345_v34  ;;  %v204_v39 = vsel %vm770_vm5, %v201_v17, %v198_v15  ;;  %v268_v1 = vmul.f32 -0.5, %v345_v34  ;;  %v168_v48 = vadd.f32 %v167_v30, %v166_v29 }
  0x81   :  { %v349_v28 = vpop.eup %348  ;;  %v237_v43 = vmul.f32 0.6931472, %v347_v22  ;;  %v205_v49 = vadd.f32 %v195_v31, %v713_v6  ;;  %v206_v50 = vadd.f32 %v204_v39, %v718_v10  ;;  %v234_v51 = vsel %vm790_vm6, %v231_v60, %v228_v40 }
  0x82   :  { %350 = vlog2.f32 %v265_v26  ;;  %v274_v2 = vadd.f32 1.0, %v349_v28  ;;  %v277_v0 = vmul.f32 -0.5, %v349_v28  ;;  %v269_v52 = vadd.f32 1.0, %v268_v1 }
  0x83   :  { %v243_v61 = vsel %vm794_vm7, %v240_v35, %v237_v43  ;;  %v130_v53 = vadd.f32 %v129_v8, %v128_v44  ;;  %v271_v14 = vand.u32 2147483647, %v345_v34  ;;  %v169_v23 = vmul.f32 0.2, %v168_v48 }
  0x84   :  { %352 = vlog2.f32 %v274_v2  ;;  %v207_v6 = vadd.f32 %v206_v50, %v205_v49  ;;  %v244_v27 = vadd.f32 %v234_v51, %v216_v45  ;;  %v245_v10 = vadd.f32 %v243_v61, %v217_v47 }
  0x85   :  { %v278_v54 = vadd.f32 1.0, %v277_v0  ;;  %v270_v58 = vmul.f32 %v345_v34, %v269_v52  ;;  %v280_v41 = vand.u32 2147483647, %v349_v28  ;;  %vm272_vm8 = vcmp.lt.f32.partialorder %v271_v14, 0.0004427343 }
  0x86   :  { %v170_v63 = vadd.f32 %v169_v23, %v130_v53  ;;  %v208_v3 = vmul.f32 0.2, %v207_v6  ;;  %v246_v46 = vadd.f32 %v245_v10, %v244_v27 }
  0x87   :  { %v279_v37 = vmul.f32 %v349_v28, %v278_v54  ;;  %vm281_vm9 = vcmp.lt.f32.partialorder %v280_v41, 0.0004427343 }
  0x88   :  { %v209_v11 = vadd.f32 %v208_v3, %v170_v63  ;;  %v247_v12 = vmul.f32 0.2, %v246_v46 }
  0x8a   :  { %v248_v38 = vadd.f32 %v247_v12, %v209_v11 }
  0x8c   :  { %v351_v59 = vpop.eup %350 }
  0x8d   :  { %v267_v32 = vmul.f32 0.6931472, %v351_v59 }
  0x8e   :  { %v353_v5 = vpop.eup %352 }
  0x8f   :  { %v273_v33 = vsel %vm272_vm8, %v270_v58, %v267_v32  ;;  %v276_v9 = vmul.f32 0.6931472, %v353_v5 }
  0x90   :  { %v283_v13 = vadd.f32 %v273_v33, %v255_v62 }
  0x91   :  { %v282_v15 = vsel %vm281_vm9, %v279_v37, %v276_v9 }
  0x92   :  { %v284_v36 = vadd.f32 %v282_v15, %v256_v7 }
  0x94   :  { %v285_v17 = vadd.f32 %v284_v36, %v283_v13 }
  0x96   :  { %v286_v34 = vmul.f32 0.2, %v285_v17 }
  0x98   :  { %v287_v18 = vadd.f32 %v286_v34, %v248_v38 }
  0x9a   :  { %288 = vst [vmem:[#allocation11] sm:$0xff] %v287_v18 }
  0x9b   :  { %475 = shalt.err (!%p472_p2)
}
  0x9c   :  { %s476_s14 = scalar_lea.hbm %s835_s6, 128 }
  0x9d   :  { %p477_p3 = scmp.ne.s32.totalorder %s835_s6, %s476_s14  ;;  %p480_p4 = scmp.lt.u32.totalorder %s476_s14, %s835_s6 }
  0x9f   :  { %p482_p5 = pnand %p480_p4, %p477_p3 }
  0xa1   :  { %485 = shalt.err (!%p482_p5)
}
  0xa2   :  { %298 = dma.vmem_to_hbm [thread:$0]  %s296_s3, 128, %s835_s6, [#allocation4]  }
  0xa3   :  { %492 = dma.done.wait [#allocation4], 128  }
  0xa4   :  { %493 = vsyncadd [#allocation4], 4294967168 }
  0xa5   :  { %302 = vsyncpa [#allocation3], 1 }
  0xa6   :  { %303 = vsyncpa [#allocation6], 1 }
  0xa7   :  { %304 = vsyncpa [#allocation9], 1 }
  0xa8   :  { %305 = vsyncpa [#allocation4], 1 }

</bundles_post_ra>
